<compile_context>
chip_gen: v7x
topology: tpu7x:2x2x1
jax: 0.10.0
libtpu: 0.0.40
codegen_flags: <defaults>
</compile_context>

<pallas_src>
import math
from functools import partial

import jax
import jax.numpy as jnp
from jax.experimental import pallas as pl
from jax.experimental.pallas import tpu as pltpu

_LANE = 128
_HEADROOM = 4 << 20          # VMEM slack on top of the double-buffered footprint
_TILE_CAP = 4 << 20          # per-buffer tile byte cap (6x this still fits 32 MiB scoped)


def _sublane(dtype):
    # sublane packing: 8 for 4-byte, 16 for 2-byte, 32 for 1-byte dtypes
    itemsize = jnp.dtype(dtype).itemsize
    return max(8, 32 // max(1, itemsize))


def _vmem_budget_bytes():
    """Generation-aware VMEM budget for the kernel's scoped allocation."""
    try:
        cap = pltpu.get_tpu_info().vmem_capacity_bytes
    except Exception:
        cap = 64 << 20  # conservative (v7x physical)
    return min((cap * 3) // 4, 48 << 20)


def _pick_hw_tile(hw, rows, itemsize, cap_bytes):
    """Last block dim: prefer the FULL hw (one contiguous DMA per channel row).
    Only tile (in 128-multiples dividing hw) when hw is a 128-multiple AND the
    full-hw block would exceed the per-tile byte cap."""
    if rows * hw * itemsize <= cap_bytes or hw % _LANE != 0:
        return hw
    best = _LANE
    t = _LANE
    while t <= hw:
        if hw % t == 0 and rows * t * itemsize <= cap_bytes:
            best = t
        t += _LANE
    return best


def _pick_c_tile(c1, c2, sub, hw_tile, itemsize, cap_bytes):
    """Largest multiple of `sub` dividing gcd(c1, c2) within the per-tile byte cap."""
    g = math.gcd(c1, c2)
    if g % sub != 0:
        return None
    best = sub
    for d in range(sub, g + 1, sub):
        if g % d == 0 and d * hw_tile * itemsize <= cap_bytes:
            best = d
    return best


# ---------------------------------------------------------------------------
# Kernels
# ---------------------------------------------------------------------------
def _concat_select_kernel(a_ref, b_ref, o_ref, *, nca):
    """Aligned path: each grid step writes one full output tile, sourced from a or b."""
    ci = pl.program_id(2)

    @pl.when(ci < nca)
    def _():
        o_ref[...] = a_ref[...]

    @pl.when(ci >= nca)
    def _():
        o_ref[...] = b_ref[...]


def _concat_fullc_kernel(a_ref, b_ref, o_ref, *, c1):
    """Fallback path: full channels per block (second write may be sublane-masked).
    Hot layers hitting this path should pad channel counts upstream instead."""
    o_ref[:, :c1, :] = a_ref[...]
    o_ref[:, c1:, :] = b_ref[...]


# ---------------------------------------------------------------------------
# Wrapper
# ---------------------------------------------------------------------------
def route_concat(a, b):
    assert a.dtype == b.dtype, "route concat requires matching dtypes"
    n, c1, h, w = a.shape
    n2, c2, h2, w2 = b.shape
    assert (n, h, w) == (n2, h2, w2), "route concat requires matching N, H, W"

    dtype = a.dtype
    itemsize = jnp.dtype(dtype).itemsize
    sub = _sublane(dtype)
    hw = h * w
    c_out = c1 + c2

    af = a.reshape(n, c1, hw)
    bf = b.reshape(n, c2, hw)

    budget = _vmem_budget_bytes()
    # Exact bytes moved (no padding path anymore).
    bytes_accessed = (n * c1 * hw + n * c2 * hw + n * c_out * hw) * itemsize
    cost = pl.CostEstimate(flops=0, transcendentals=0, bytes_accessed=bytes_accessed)

    # ---- Preferred: sublane-aligned, channel-tiled, full-HW contiguous tiles ----
    c_tile = None
    if c1 % sub == 0 and c2 % sub == 0:
        cap = min(_TILE_CAP, max(sub * _LANE * itemsize, (budget - _HEADROOM) // 6))
        hw_tile = _pick_hw_tile(hw, rows=sub, itemsize=itemsize, cap_bytes=cap)
        c_tile = _pick_c_tile(c1, c2, sub, hw_tile, itemsize, cap_bytes=cap)

    if c_tile is not None:
        n_hw = hw // hw_tile
        nca = c1 // c_tile
        ncb = c2 // c_tile
        tile_bytes = c_tile * hw_tile * itemsize
        needed = 2 * 3 * tile_bytes          # double-buffered a, b, out tiles
        vmem_limit = needed + _HEADROOM

        out = pl.pallas_call(
            partial(_concat_select_kernel, nca=nca),
            out_shape=jax.ShapeDtypeStruct((n, c_out, hw), dtype),
            grid_spec=pltpu.PrefetchScalarGridSpec(
                num_scalar_prefetch=0,
                # channel axis last: clamped input block indices repeat on consecutive
                # steps, so redundant re-DMA is skipped within each core's sweep.
                grid=(n, n_hw, nca + ncb),
                in_specs=[
                    pl.BlockSpec(
                        (1, c_tile, hw_tile),
                        lambda ni, hi, ci: (ni, jnp.minimum(ci, nca - 1), hi),
                    ),
                    pl.BlockSpec(
                        (1, c_tile, hw_tile),
                        lambda ni, hi, ci: (ni, jnp.maximum(ci - nca, 0), hi),
                    ),
                ],
                out_specs=pl.BlockSpec(
                    (1, c_tile, hw_tile), lambda ni, hi, ci: (ni, ci, hi)
                ),
            ),
            compiler_params=pltpu.CompilerParams(
                # every grid step writes a distinct output block -> all axes parallel
                # (lets v7x shard the channel axis across both TensorCores).
                dimension_semantics=("parallel", "parallel", "parallel"),
                vmem_limit_bytes=vmem_limit,
            ),
            cost_estimate=cost,
        )(af, bf)
    else:
        # ---- Fallback: full channels per block; only N (and maybe HW) are tiled ----
        cap = min(_TILE_CAP, max(c_out * _LANE * itemsize, (budget - _HEADROOM) // 4))
        hw_tile = _pick_hw_tile(hw, rows=c_out, itemsize=itemsize, cap_bytes=cap)
        n_hw = hw // hw_tile
        needed = 2 * (c1 + c2 + c_out) * hw_tile * itemsize
        vmem_limit = needed + _HEADROOM

        out = pl.pallas_call(
            partial(_concat_fullc_kernel, c1=c1),
            out_shape=jax.ShapeDtypeStruct((n, c_out, hw), dtype),
            grid_spec=pltpu.PrefetchScalarGridSpec(
                num_scalar_prefetch=0,
                grid=(n, n_hw),
                in_specs=[
                    pl.BlockSpec((1, c1, hw_tile), lambda ni, hi: (ni, 0, hi)),
                    pl.BlockSpec((1, c2, hw_tile), lambda ni, hi: (ni, 0, hi)),
                ],
                out_specs=pl.BlockSpec((1, c_out, hw_tile), lambda ni, hi: (ni, 0, hi)),
            ),
            compiler_params=pltpu.CompilerParams(
                dimension_semantics=("parallel", "parallel"),
                vmem_limit_bytes=vmem_limit,
            ),
            cost_estimate=cost,
        )(af, bf)

    return out.reshape(n, c_out, h, w)


class RouteLayer:
    """JAX/Pallas port of the PyTorch RouteLayer. `cache` is a list of NCHW arrays."""

    def __init__(self, index, first, second, cache):
        self.index = index
        self.first = first
        self.second = second
        self.cache = cache

    def __call__(self, x):
        # `x` is ignored, exactly like the PyTorch forward (it is overwritten).
        if self.second == 0:
            # Pure pass-through: return the immutable cached array (no kernel, no copy).
            return self.cache[self.index + self.first]
        return route_concat(
            self.cache[self.index + self.first],
            self.cache[self.index + self.second],
        )


if __name__ == "__main__":
    key = jax.random.PRNGKey(0)
    keys = jax.random.split(key, 16)

    # --- Case 1: aligned channel-tiled concat path (C multiple of sublane=8, HW % 128 == 0)
    N, C, H, W = 2, 8, 16, 16
    cache = [jax.random.normal(keys[i], (N, C, H, W), dtype=jnp.float32) for i in range(4)]
    x_dummy = jax.random.normal(keys[4], (N, C, H, W), dtype=jnp.float32)

    layer_cat = RouteLayer(index=3, first=-1, second=-3, cache=cache)
    out_cat = jax.block_until_ready(layer_cat(x_dummy))
    ref_cat = jnp.concatenate((cache[3 - 1], cache[3 - 3]), axis=1)
    assert out_cat.shape == (N, 2 * C, H, W)
    assert jnp.array_equal(out_cat, ref_cat)

    # --- Case 2: pass-through branch (second == 0) — no kernel, aliases the cache entry
    layer_sel = RouteLayer(index=3, first=-2, second=0, cache=cache)
    out_sel = jax.block_until_ready(layer_sel(x_dummy))
    assert out_sel.shape == (N, C, H, W)
    assert jnp.array_equal(out_sel, cache[3 - 2])

    # --- Case 3: fallback path (channels not sublane-aligned: C=4)
    Cs = 4
    cache_s = [jax.random.normal(keys[5 + i], (N, Cs, H, W), dtype=jnp.float32) for i in range(4)]
    layer_cat_s = RouteLayer(index=3, first=-1, second=-3, cache=cache_s)
    out_cat_s = jax.block_until_ready(layer_cat_s(x_dummy))
    ref_cat_s = jnp.concatenate((cache_s[3 - 1], cache_s[3 - 3]), axis=1)
    assert out_cat_s.shape == (N, 2 * Cs, H, W)
    assert jnp.array_equal(out_cat_s, ref_cat_s)

    # --- Case 4: odd spatial size (H*W=169, not a 128-multiple) — full-HW last block dim,
    #             no padding / slicing round trip anymore.
    Ho = Wo = 13
    cache_o = [jax.random.normal(keys[9 + i], (N, C, Ho, Wo), dtype=jnp.float32) for i in range(4)]
    layer_cat_o = RouteLayer(index=3, first=-1, second=-2, cache=cache_o)
    out_cat_o = jax.block_until_ready(layer_cat_o(x_dummy))
    ref_cat_o = jnp.concatenate((cache_o[3 - 1], cache_o[3 - 2]), axis=1)
    assert out_cat_o.shape == (N, 2 * C, Ho, Wo)
    assert jnp.array_equal(out_cat_o, ref_cat_o)

    # --- Case 5: odd HW + non-aligned channels (fallback path, full-HW blocks)
    cache_f = [jax.random.normal(keys[13 + i], (N, Cs, Ho, Wo), dtype=jnp.float32) for i in range(3)]
    layer_cat_f = RouteLayer(index=2, first=-1, second=-2, cache=cache_f)
    out_cat_f = jax.block_until_ready(layer_cat_f(x_dummy))
    ref_cat_f = jnp.concatenate((cache_f[2 - 1], cache_f[2 - 2]), axis=1)
    assert out_cat_f.shape == (N, 2 * Cs, Ho, Wo)
    assert jnp.array_equal(out_cat_f, ref_cat_f)

    print("KERNEL_OK")
</pallas_src>

<mosaic_0001>
module attributes {stable_mosaic.version = 11 : i64} {
  func.func @_concat_select_kernel(%arg0: i32, %arg1: i32, %arg2: i32, %arg3: memref<1x8x256xf32, #tpu.memory_space<vmem>>, %arg4: memref<1x8x256xf32, #tpu.memory_space<vmem>>, %arg5: memref<1x8x256xf32, #tpu.memory_space<vmem>>) attributes {dimension_semantics = [#tpu.dimension_semantics<parallel>, #tpu.dimension_semantics<parallel>, #tpu.dimension_semantics<parallel>], iteration_bounds = array<i64: 2, 1, 2>, scalar_prefetch = 0 : i64, scratch_operands = 0 : i64, tpu.core_type = #tpu.core_type<tc>, window_params = [{transform_indices = @transform_0, window_bounds = array<i64: 1, 8, 256>}, {transform_indices = @transform_1, window_bounds = array<i64: 1, 8, 256>}, {transform_indices = @transform_2, window_bounds = array<i64: 1, 8, 256>}]} {
    %c1_i32 = arith.constant 1 : i32
    %0 = arith.cmpi slt, %arg2, %c1_i32 : i32
    %1 = arith.extui %0 : i1 to i32
    %c0_i32 = arith.constant 0 : i32
    %2 = arith.cmpi ne, %1, %c0_i32 : i32
    scf.if %2 {
      %c0 = arith.constant 0 : index
      %c0_2 = arith.constant 0 : index
      %c0_3 = arith.constant 0 : index
      %6 = vector.load %arg3[%c0, %c0_2, %c0_3] : memref<1x8x256xf32, #tpu.memory_space<vmem>>, vector<1x8x256xf32>
      %c0_4 = arith.constant 0 : index
      %c0_5 = arith.constant 0 : index
      %c0_6 = arith.constant 0 : index
      %7 = vector.load %arg5[%c0_4, %c0_5, %c0_6] : memref<1x8x256xf32, #tpu.memory_space<vmem>>, vector<1x8x256xf32>
      tpu.vector_store %arg5[%c0_4, %c0_5, %c0_6], %6 {strides = array<i32>} : memref<1x8x256xf32, #tpu.memory_space<vmem>>, vector<1x8x256xf32>,
    } else {
    }
    %c1_i32_0 = arith.constant 1 : i32
    %3 = arith.cmpi sge, %arg2, %c1_i32_0 : i32
    %4 = arith.extui %3 : i1 to i32
    %c0_i32_1 = arith.constant 0 : i32
    %5 = arith.cmpi ne, %4, %c0_i32_1 : i32
    scf.if %5 {
      %c0 = arith.constant 0 : index
      %c0_2 = arith.constant 0 : index
      %c0_3 = arith.constant 0 : index
      %6 = vector.load %arg4[%c0, %c0_2, %c0_3] : memref<1x8x256xf32, #tpu.memory_space<vmem>>, vector<1x8x256xf32>
      %c0_4 = arith.constant 0 : index
      %c0_5 = arith.constant 0 : index
      %c0_6 = arith.constant 0 : index
      %7 = vector.load %arg5[%c0_4, %c0_5, %c0_6] : memref<1x8x256xf32, #tpu.memory_space<vmem>>, vector<1x8x256xf32>
      tpu.vector_store %arg5[%c0_4, %c0_5, %c0_6], %6 {strides = array<i32>} : memref<1x8x256xf32, #tpu.memory_space<vmem>>, vector<1x8x256xf32>,
    } else {
    }
    return
  }
  func.func @transform_0(%arg0: i32, %arg1: i32, %arg2: i32) -> (i32, i32, i32) {
    %c0_i32 = arith.constant 0 : i32
    %0 = arith.minsi %arg2, %c0_i32 : i32
    %c0_i32_0 = arith.constant 0 : i32
    return %arg0, %0, %arg1 : i32, i32, i32
  }
  func.func @transform_1(%arg0: i32, %arg1: i32, %arg2: i32) -> (i32, i32, i32) {
    %c1_i32 = arith.constant 1 : i32
    %0 = arith.subi %arg2, %c1_i32 : i32
    %c0_i32 = arith.constant 0 : i32
    %1 = arith.maxsi %0, %c0_i32 : i32
    %c0_i32_0 = arith.constant 0 : i32
    return %arg0, %1, %arg1 : i32, i32, i32
  }
  func.func @transform_2(%arg0: i32, %arg1: i32, %arg2: i32) -> (i32, i32, i32) {
    %c0_i32 = arith.constant 0 : i32
    return %arg0, %arg2, %arg1 : i32, i32, i32
  }
}

</mosaic_0001>

<bundles_post_ra>
// kernel: tpu_custom_call.1
= control target key start
LH: loop header
LB: loop body
LE: loop exit
PB: predicated region body
PF: predicated region fallthrough
CT: control target
= control target key end

     0   :  { %7 = vsyncpa [#allocation3], 0  ;;  %s1138_s0 = inlined_call_operand.hbm [shape: f32[2,8,256], index: 0, kind: input, shape index: {}]   ;;  %s1139_s1 = inlined_call_operand.hbm [shape: f32[2,8,256], index: 1, kind: input, shape index: {}]   ;;  %s1140_s2 = inlined_call_operand.hbm [shape: f32[2,16,256], index: 2, kind: output, shape index: {}]  }
   0x1   :  { %9 = vsyncpa [#allocation3 + $0x1], 0 }
   0x2   :  { %10 = vsyncpa [#allocation6], 0 }
   0x3   :  { %12 = vsyncpa [#allocation6 + $0x1], 0 }
   0x4   :  { %13 = vsyncpa [#allocation4], 0 }
   0x5   :  { %15 = vsyncpa [#allocation4 + $0x1], 0  ;;  %s807_s9 = smov 0   ;;  %s809_s10 = smov 0  }
   0x6   :  { %s811_s11 = smov 0   ;;  %s813_s12 = smov 0  }
   0x7   :  { %s815_s13 = smov 0   ;;  %s817_s14 = smov 0  }
   0x8   :  { %s819_s15 = smov 0   ;;  %s821_s16 = smov 0  }
   0x9   :  { %s823_s17 = smov 0   ;;  %s825_s18 = smov 0  }
   0xa   :  { %s827_s19 = smov 0   ;;  %s829_s20 = smov 0  }
   0xb   :  { %s831_s21 = smov 0   ;;  %s833_s22 = smov 0  }
   0xc LB: > { %1152 = sst [smem:[#allocation11_spill]] %s767_s17  ;;  %s417_s23 = sadd.s32 4294967295, %s787_s22   ;;  %s787_s22 = sphi %s833_s22, %s21_s22   ;;  %s783_s21 = sphi %s831_s21, %s1191_s21   ;;  %s779_s20 = sphi %s829_s20, %s1180_s20   ;;  %s775_s19 = sphi %s827_s19, %s1190_s19   ;;  %s771_s18 = sphi %s825_s18, %s1179_s18   ;;  %s767_s17 = sphi %s823_s17, %s1178_s17   ;;  %s763_s16 = sphi %s821_s16, %s1189_s16   ;;  %s759_s15 = sphi %s819_s15, %s1188_s15   ;;  %s755_s14 = sphi %s817_s14, %s1187_s14   ;;  %s751_s13 = sphi %s815_s13, %s1186_s13   ;;  %s747_s12 = sphi %s813_s12, %s1185_s12   ;;  %s743_s11 = sphi %s811_s11, %s1184_s11   ;;  %s739_s10 = sphi %s809_s10, %s1183_s10   ;;  %s735_s9 = sphi %s807_s9, %s1182_s9  }
   0xd   : > { %1153 = sst [smem:[#allocation12_spill]] %s779_s20  ;;  %s418_s24 = sadd.s32 4294967294, %s787_s22  }
   0xe   : > { %s33_s25 = sadd.s32 1, %s779_s20  ;;  %s40_s26 = sadd.s32 1, %s783_s21 }
   0xf   : > { %p34_p0 = scmp.ge.s32.totalorder %s33_s25, 2  ;;  %s55_s27 = sadd.s32 1, %s767_s17 }
  0x10   : > { %p62_p1 = scmp.ne.s32.totalorder %s767_s17, %s763_s16  ;;  %p1148_p3 = scmp.eq.s32.totalorder %s787_s22, 0 }
  0x11   : > { %s1193_s25 = smov (%p34_p0, %s33_s25), 0  ;;  %s1195_s26 = smov (!%p34_p0, %s40_s26), %s783_s21 }
  0x12   : > { %1154 = sst [smem:[#allocation13_spill]] %s1193_s25  ;;  %p42_p2 = scmp.ge.s32.totalorder %s1195_s26, 2 }
  0x13   : > { %p68_p4 = scmp.ne.s32.totalorder %s763_s16, %s759_s15  ;;  %p895_p5 = por %p1148_p3, %p62_p1 }
  0x14   : > { %s1197_s26 = smov (%p42_p2, %s1195_s26), 0  ;;  %p899_p6 = scmp.eq.s32.totalorder %s417_s23, 0 }
  0x15   : > { %1155 = sst [smem:[#allocation14_spill]] %s1197_s26  ;;  %s891_s28 = ssub.s32 %s783_s21, %s1197_s26 }
  0x16   : > { %s115_s3 = ssub.s32 %s779_s20, %s1193_s25  ;;  %p1147_p7 = scmp.eq.s32.totalorder %s891_s28, 0 }
  0x17   : > { %p908_p8 = por %p899_p6, %p68_p4  ;;  %s116_s5 = sor.u32 %s115_s3, %s891_s28 }
  0x18   : > { %s121_s6 = sadd.s32 1, %s743_s11  ;;  %p119_p9 = scmp.eq.s32.totalorder %s116_s5, 0 }
  0x19   : > { %s1158_s4 = scalar_select %p908_p8, 1, 0 }
  0x1a   : > { %s917_s7 = scalar_select %p1147_p7, %s767_s17, %s55_s27  }
  0x1b   : > { %p131_p10 = scmp.ne.s32.totalorder %s743_s11, %s739_s10  ;;  %p132_p11 = scmp.eq.s32.totalorder %s417_s23, 3 }
  0x1c   : > { %1159 = sst [smem:[#allocation15_spill]] %s917_s7  ;;  %p137_p12 = scmp.ne.s32.totalorder %s739_s10, %s735_s9 }
  0x1d   : > { %s924_s8 = scalar_select %p119_p9, %s743_s11, %s121_s6  }
  0x1e   : > { %p926_p13 = por %p132_p11, %p131_p10  ;;  %p138_p0 = scmp.eq.s32.totalorder %s418_s24, 3 }
  0x1f   : > { %p1146_p1 = scmp.lt.s32.totalorder %s787_s22, 4  ;;  %s158_s3 = sand.u32 1, %s767_s17  }
  0x20   : > { %s1160_s15 = scalar_select %p926_p13, 1, 0 }
  0x21   : > { %p931_p2 = por %p138_p0, %p137_p12  ;;  %s423_s5 = sshll.u32 %s158_s3, 4 }
  0x22   : > { %s162_s26 = scalar_lea.vmem [#allocation2], %s423_s5  ;;  %s1144_s23 = sshll.u32 %s783_s21, 8 }
  0x23   : > { %s1161_s27 = scalar_select %p931_p2, 1, 0 }
  0x24   : > { %s176_s25 = sshll.u32 %s162_s26, 4  ;;  %p943_p4 = pnand %p1146_p1, %p895_p5  ;;  %s936_s25 = int_to_ptr.vmem [resolvable:$true] %s176_s25 }
  0x25   : > { %s952_s7 = scalar_lea.hbm %s1138_s0, %s1144_s23  ;;  %s159_s26 = scalar_lea.sflag [#allocation3], %s158_s3 }
  0x26   : > { %s575_s29 = scalar_lea.hbm %s952_s7, 256  ;;  %p577_p11 = pneg %p943_p4 }
  0x27   : > { %p576_p5 = scmp.ne.s32.totalorder %s952_s7, %s575_s29  ;;  %s580_s24 = scalar_lea.hbm %s1138_s0, 512 }
  0x28   : > { %p581_p1 = scmp.lt.u32.totalorder %s952_s7, %s1138_s0  ;;  %p582_p7 = scmp.lt.u32.totalorder %s580_s24, %s575_s29 }
  0x29   : > { %p578_p12 = pnand %p577_p11, %p576_p5  ;;  %p584_p9 = scmp.lt.u32.totalorder %s575_s29, %s952_s7 }
  0x2a   : > { %p583_p3 = por %p582_p7, %p581_p1 }
  0x2b   : > { %p579_p0 = pneg %p578_p12 }
  0x2c   : > { %p585_p10 = por %p584_p9, %p583_p3 }
  0x2e   : > { %p586_p2 = pnand %p585_p10, %p579_p0 }
  0x30   : > { %589 = shalt.err (!%p586_p2)
}
  0x31   : > { %s590_s3 = scalar_lea.vmem %s936_s25, 256  ;;  %s789_s20 = smov [#allocation2]  }
  0x32   : > { %p591_p5 = scmp.ne.s32.totalorder %s936_s25, %s590_s3  ;;  %s595_s5 = sshll.u32 %s789_s20, 4  ;;  %s596_s5 = int_to_ptr.vmem [resolvable:$false] %s595_s5 }
  0x33   : > { %s597_s17 = scalar_lea.vmem %s596_s5, 512  ;;  %p598_p8 = scmp.lt.s32.totalorder %s936_s25, %s596_s5 }
  0x34   : > { %p593_p12 = pnand %p591_p5, %p577_p11  ;;  %p599_p7 = scmp.lt.s32.totalorder %s597_s17, %s590_s3 }
  0x36   : > { %p594_p13 = pneg %p593_p12  ;;  %p600_p1 = por %p599_p7, %p598_p8 }
  0x38   : > { %p601_p3 = pnand %p600_p1, %p594_p13 }
  0x3a   : > { %604 = shalt.err (!%p601_p3)
}
  0x3b   : > { %453 = dma.hbm_to_vmem [thread:$0]  (!%p943_p4), %s952_s7, 256, %s936_s25, %s159_s26  }
  0x3c   : > { %p1163_p8 = scmp.lt.s32.totalorder %s787_s22, 5  ;;  %p1164_p13 = scmp.ge.s32.totalorder %s787_s22, 1 }
  0x3d   : > { %s91_s6 = sadd.s32 1, %s755_s14  ;;  %p98_p9 = scmp.ne.s32.totalorder %s755_s14, %s751_s13 }
  0x3e   : > { %p985_p2 = pnand %p1164_p13, %p1163_p8  ;;  %p104_p10 = scmp.ne.s32.totalorder %s751_s13, %s747_s12 }
  0x3f   : > { %s183_s29 = sand.u32 1, %s755_s14   ;;  %p1166_p11 = scmp.eq.s32.totalorder %s787_s22, 0 }
  0x40   : > { %p999_p5 = por %p104_p10, %p899_p6  ;;  %s427_s3 = sshll.u32 %s183_s29, 4 }
  0x41   : > { %p100_p0 = por %p98_p9, %p1166_p11  ;;  %p1168_p12 = scmp.eq.s32.totalorder %s891_s28, 0 }
  0x42   : > { %s1167_s24 = scalar_select %p999_p5, 1, 0 }
  0x43   : > { %s1006_s25 = scalar_select %p1168_p12, %s755_s14, %s91_s6  }
  0x44   : > { %s187_s7 = scalar_lea.vmem [#allocation5], %s427_s3  ;;  %s1169_s20 = sshll.u32 %s783_s21, 8 }
  0x45   : > { %s202_s26 = sshll.u32 %s187_s7, 4  ;;  %s1015_s12 = scalar_lea.hbm %s1139_s1, %s1169_s20  ;;  %s1008_s26 = int_to_ptr.vmem [resolvable:$true] %s202_s26 }
  0x46   : > { %p1170_p4 = scmp.lt.s32.totalorder %s787_s22, 4  ;;  %s184_s28 = scalar_lea.sflag [#allocation6], %s183_s29 }
  0x47   : > { %s605_s6 = scalar_lea.hbm %s1015_s12, 256  ;;  %s610_s20 = scalar_lea.hbm %s1139_s1, 512 }
  0x48   : > { %p1019_p6 = pnand %p1170_p4, %p100_p0  ;;  %p606_p7 = scmp.ne.s32.totalorder %s1015_s12, %s605_s6 }
  0x49   : > { %p611_p13 = scmp.lt.u32.totalorder %s1015_s12, %s1139_s1  ;;  %p612_p9 = scmp.lt.u32.totalorder %s610_s20, %s605_s6 }
  0x4a   : > { %p607_p1 = pneg %p1019_p6  ;;  %p614_p11 = scmp.lt.u32.totalorder %s605_s6, %s1015_s12 }
  0x4b   : > { %p613_p10 = por %p612_p9, %p611_p13 }
  0x4c   : > { %p608_p3 = pnand %p607_p1, %p606_p7 }
  0x4d   : > { %p615_p0 = por %p614_p11, %p613_p10 }
  0x4e   : > { %p609_p8 = pneg %p608_p3 }
  0x50   : > { %p616_p12 = pnand %p615_p0, %p609_p8 }
  0x52   : > { %619 = shalt.err (!%p616_p12)
}
  0x53   : > { %s620_s29 = scalar_lea.vmem %s1008_s26, 256  ;;  %s790_s3 = smov [#allocation5]  }
  0x54   : > { %p621_p4 = scmp.ne.s32.totalorder %s1008_s26, %s620_s29  ;;  %s625_s7 = sshll.u32 %s790_s3, 4  ;;  %s626_s7 = int_to_ptr.vmem [resolvable:$false] %s625_s7 }
  0x55   : > { %s627_s5 = scalar_lea.vmem %s626_s7, 512  ;;  %p628_p5 = scmp.lt.s32.totalorder %s1008_s26, %s626_s7 }
  0x56   : > { %p623_p7 = pnand %p621_p4, %p607_p1  ;;  %p629_p13 = scmp.lt.s32.totalorder %s627_s5, %s620_s29 }
  0x58   : > { %p624_p3 = pneg %p623_p7  ;;  %p630_p9 = por %p629_p13, %p628_p5 }
  0x5a   : > { %p631_p10 = pnand %p630_p9, %p624_p3 }
  0x5c   : > { %634 = shalt.err (!%p631_p10)
}
  0x5d   : > { %456 = dma.hbm_to_vmem [thread:$0]  (!%p1019_p6), %s1015_s12, 256, %s1008_s26, %s184_s28  }
  0x5e   : > { %211 = sbr.rel (%p985_p2) target bundleno = 151 (0x97), region = 28  ;;  %s213_s6 = sand.u32 (!%p985_p2), 1, %s763_s16  }
  0x5f   : > { %s433_s20 = sshll.u32 (!%p985_p2), %s213_s6, 4  ;;  %s214_s17 = scalar_lea.sflag (!%p985_p2), [#allocation3], %s213_s6 }
  0x60   : > { %s217_s3 = scalar_lea.vmem (!%p985_p2), [#allocation2], %s433_s20  ;;  %p1172_p1 = scmp.ne.s32.totalorder (!%p985_p2), %s1158_s4, 0 }
  0x65   : > { %720 = dma.done.wait (%p1172_p1), %s214_s17, 256  }
  0x66   : > { %722 = vsyncadd (%p1172_p1), %s214_s17, 4294967040  ;;  %s222_s30 = sand.u32 1, %s751_s13   ;;  %p1173_p5 = scmp.ne.s32.totalorder %s1167_s24, 0 }
  0x67   : > { %s434_s29 = sshll.u32 %s222_s30, 4  ;;  %s223_s7 = scalar_lea.sflag [#allocation6], %s222_s30 }
  0x68   : > { %s226_s26 = scalar_lea.vmem [#allocation5], %s434_s29 }
  0x69   : > { %724 = dma.done.wait (%p1173_p5), %s223_s7, 256  }
  0x6a   : > { %726 = vsyncadd (%p1173_p5), %s223_s7, 4294967040  ;;  %s249_s23 = sand.u32 1, %s739_s10   ;;  %p436_p2 = scmp.ge.s32.totalorder %s771_s18, 1 }
  0x6b   : > { %s435_s12 = sshll.u32 %s249_s23, 4  ;;  %v264_v0 = vld [vmem:[%s217_s3] sm:$0xff] (!%p436_p2)  ;;  %v265_v1 = vld [vmem:[%s217_s3 + $0x8] sm:$0xff] (!%p436_p2) }
  0x6c   : > { %s251_s28 = scalar_lea.vmem [#allocation7], %s435_s12  ;;  %263 = sbr.rel (%p436_p2) target bundleno = 115 (0x73), region = 40 }
  0x6d   : > { %266 = vst [vmem:[%s251_s28] sm:$0xff] (!%p436_p2), %v264_v0  ;;  %267 = vst [vmem:[%s251_s28 + $0x8] sm:$0xff] (!%p436_p2), %v265_v1 }
  0x73 PF: > { %p437_p6 = scmp.lt.s32.totalorder %s771_s18, 1 }
  0x74   : > { %v272_v2 = vld [vmem:[%s226_s26] sm:$0xff] (!%p437_p6)  ;;  %v273_v3 = vld [vmem:[%s226_s26 + $0x8] sm:$0xff] (!%p437_p6) }
  0x75   : > { %271 = sbr.rel (%p437_p6) target bundleno = 124 (0x7c), region = 44  ;;  %274 = vst [vmem:[%s251_s28] sm:$0xff] (!%p437_p6), %v272_v2  ;;  %275 = vst [vmem:[%s251_s28 + $0x8] sm:$0xff] (!%p437_p6), %v273_v3 }
  0x7c PF: > { %s439_s4 = sshll.u32 %s771_s18, 1  ;;  %s440_s24 = sshll.u32 %s775_s19, 2 }
  0x7d   : > { %s295_s5 = sshll.u32 %s251_s28, 4  ;;  %s291_s6 = sadd.s32 %s440_s24, %s439_s4  ;;  %s1065_s5 = int_to_ptr.vmem [resolvable:$true] %s295_s5 }
  0x7e   : > { %s441_s20 = sshll.u32 %s291_s6, 7  ;;  %s277_s29 = scalar_lea.sflag [#allocation4], %s249_s23 }
  0x7f   : > { %s293_s30 = scalar_lea.hbm %s1140_s2, %s441_s20  ;;  %s635_s7 = scalar_lea.vmem %s1065_s5, 256 }
  0x80   : > { %p636_p8 = scmp.ne.s32.totalorder %s1065_s5, %s635_s7  ;;  %p1174_p11 = scmp.ne.s32.totalorder %s1160_s15, 0 }
  0x81   : > { %s791_s18 = smov [#allocation7]  }
  0x82   : > { %p637_p0 = pnand %p636_p8, %p1174_p11  ;;  %s639_s19 = sshll.u32 %s791_s18, 4  ;;  %s640_s19 = int_to_ptr.vmem [resolvable:$false] %s639_s19 }
  0x83   : > { %s641_s26 = scalar_lea.vmem %s640_s19, 512  ;;  %p642_p4 = scmp.lt.s32.totalorder %s1065_s5, %s640_s19 }
  0x84   : > { %p638_p12 = pneg %p637_p0  ;;  %p643_p7 = scmp.lt.s32.totalorder %s641_s26, %s635_s7 }
  0x86   : > { %p644_p3 = por %p643_p7, %p642_p4 }
  0x88   : > { %p645_p13 = pnand %p644_p3, %p638_p12 }
  0x8a   : > { %648 = shalt.err (!%p645_p13)
}
  0x8b   : > { %s649_s12 = scalar_lea.hbm %s293_s30, 256  ;;  %s653_s4 = scalar_lea.hbm %s1140_s2, 1024 }
  0x8c   : > { %p650_p9 = scmp.ne.s32.totalorder %s293_s30, %s649_s12  ;;  %p654_p5 = scmp.lt.u32.totalorder %s293_s30, %s1140_s2 }
  0x8d   : > { %p655_p2 = scmp.lt.u32.totalorder %s653_s4, %s649_s12  ;;  %p657_p8 = scmp.lt.u32.totalorder %s649_s12, %s293_s30 }
  0x8e   : > { %p651_p10 = pnand %p650_p9, %p1174_p11 }
  0x8f   : > { %p656_p6 = por %p655_p2, %p654_p5 }
  0x90   : > { %p652_p1 = pneg %p651_p10 }
  0x91   : > { %p658_p0 = por %p657_p8, %p656_p6 }
  0x93   : > { %p659_p12 = pnand %p658_p0, %p652_p1 }
  0x95   : > { %662 = shalt.err (!%p659_p12)
}
  0x96   : > { %448 = dma.vmem_to_hbm [thread:$0]  (%p1174_p11), %s1065_s5, 256, %s293_s30, %s277_s29  }
  0x97 PF: > { %p462_p4 = scmp.ge.s32.totalorder %s787_s22, 2  ;;  %s307_s20 = sand.u32 1, %s735_s9  }
  0x98   : > { %p1175_p7 = scmp.ne.s32.totalorder %s1161_s27, 0  ;;  %s308_s17 = scalar_lea.sflag [#allocation4], %s307_s20 }
  0x9a   : > { %p458_p3 = pnand %p462_p4, %p1175_p7 }
  0x9c   : > { %728 = dma.done.wait (!%p458_p3), %s308_s17, 256  }
  0x9d   : > { %730 = vsyncadd (!%p458_p3), %s308_s17, 4294967040  ;;  %s21_s22 = sadd.s32 1, %s787_s22   ;;  %s1177_s5 = sld [smem:[#allocation11_spill]] }
  0x9e   : > { %p1091_p13 = scmp.ge.s32.totalorder %s21_s22, 6   ;;  %s1178_s17 = sld [smem:[#allocation15_spill]] }
  0x9f   : > { %s1179_s18 = sld [smem:[#allocation12_spill]]  ;;  %s1180_s20 = sld [smem:[#allocation13_spill]] }
  0xa0   : > { %s1181_s27 = sld [smem:[#allocation14_spill]]  ;;  %s1182_s9 = smov %s739_s10 }
  0xa1   : > { %s1183_s10 = smov %s743_s11  ;;  %s1184_s11 = smov %s924_s8 }
  0xa2   : > { %s1185_s12 = smov %s751_s13  ;;  %s1186_s13 = smov %s755_s14 }
  0xa3   : > { %s1187_s14 = smov %s1006_s25  ;;  %s1188_s15 = smov %s763_s16 }
  0xa4   : > { %s1189_s16 = smov %s1177_s5  ;;  %s1190_s19 = smov %s783_s21 }
  0xa5   :  { %20 = sbr.rel (!%p1091_p13) target bundleno = 12 (0xc), region = 94 }
  0xa6   : > { %s1191_s21 = smov %s1181_s27 }
  0xac   :  { %313 = vsyncpa [#allocation3], 1 }
  0xad   :  { %315 = vsyncpa [#allocation3 + $0x1], 1 }
  0xae   :  { %316 = vsyncpa [#allocation6], 1 }
  0xaf   :  { %318 = vsyncpa [#allocation6 + $0x1], 1 }
  0xb0   :  { %319 = vsyncpa [#allocation4], 1 }
  0xb1   :  { %321 = vsyncpa [#allocation4 + $0x1], 1 }

</bundles_post_ra>
